<compile_context>
chip_gen: v7x
topology: tpu7x:2x2x1
jax: 0.10.0
libtpu: 0.0.40
codegen_flags: <defaults>
</compile_context>

<pallas_src>
import math
from functools import partial

import jax
import jax.numpy as jnp
from jax.experimental import pallas as pl
from jax.experimental.pallas import tpu as pltpu


# ----------------------------------------------------------------------------
# Tile-size helpers (keep double-buffered footprints under ~24 MiB so the
# explicit 32 MiB scoped-VMEM limit works on v5e/v6e/v7x alike).
# ----------------------------------------------------------------------------
_VMEM_BUDGET = 24 * 1024 * 1024
_VMEM_LIMIT = 32 * 1024 * 1024


def _pick_tile_m(m, bytes_per_row, resident_bytes):
    """Row tile for the projection kernels: full M if small, else a power-of-two
    multiple of 8 (<=1024) whose double-buffered footprint fits the budget."""
    if m <= 1024 and 2 * m * bytes_per_row + resident_bytes <= _VMEM_BUDGET:
        return m
    t = 1024
    while t > 8 and (2 * t * bytes_per_row + resident_bytes > _VMEM_BUDGET or t >= m):
        t //= 2
    return max(t, 8)


def _pick_seq_tile(total, cap, align):
    """Largest tile <= cap that divides `total` and is a multiple of `align`
    (falls back to the full extent, which always satisfies the layout rule)."""
    if total <= cap:
        return total
    t = (cap // align) * align
    while t >= align:
        if total % t == 0:
            return t
        t -= align
    return total


def _attn_tile_sizes(Sq, Sk, nh, hd):
    """Choose (tsq, tsk) for the attention kernel, shrinking if the
    double-buffered footprint (incl. the probs tile) would not fit VMEM."""
    tsq = _pick_seq_tile(Sq, 256, 8)
    tsk = _pick_seq_tile(Sk, 256, 128)

    def footprint(a, b):
        # q + k + v + probs + ctx blocks (double-buffered) + f32 accumulator scratch
        per_step = nh * (a * hd + 2 * b * hd + a * b + a * hd)
        return 4 * (2 * per_step + nh * a * hd)

    while footprint(tsq, tsk) > _VMEM_BUDGET and tsk >= 256 and Sk % (tsk // 2) == 0:
        tsk //= 2
    while footprint(tsq, tsk) > _VMEM_BUDGET and tsq >= 16 and Sq % (tsq // 2) == 0:
        tsq //= 2
    return tsq, tsk


# ----------------------------------------------------------------------------
# Kernel 1: fused multi-output projection  (Manifold_Linear xN, Euclidean)
#   o_i = x @ W_i^T + b_i   with pre-transposed stacked weights (N=3 for QKV).
# ----------------------------------------------------------------------------
def _make_multi_proj_kernel(n_out):
    def kernel(x_ref, w_ref, b_ref, *o_refs):
        # x_ref: (TM, Din); w_ref: (n, Din, Dout) pre-transposed; b_ref: (n, 1, Dout)
        x = x_ref[...]
        for idx in range(n_out):
            acc = jnp.dot(x, w_ref[idx], preferred_element_type=jnp.float32)
            o_refs[idx][...] = (acc + b_ref[idx]).astype(o_refs[idx].dtype)
    return kernel


def multi_projection(x2d, w_t_stacked, b_stacked):
    """x2d: (M, Din); w_t_stacked: (n, Din, Dout); b_stacked: (n, 1, Dout)
    -> tuple of n arrays (M, Dout).  x is read from HBM once for all n outputs."""
    M, Din = x2d.shape
    n, _, Dout = w_t_stacked.shape
    resident = 4 * n * Din * Dout + 4 * n * Dout              # weights + biases stay resident
    tm = _pick_tile_m(M, 4 * (Din + n * Dout), resident)
    return pl.pallas_call(
        _make_multi_proj_kernel(n),
        out_shape=tuple(jax.ShapeDtypeStruct((M, Dout), jnp.float32) for _ in range(n)),
        grid=(pl.cdiv(M, tm),),
        in_specs=[
            pl.BlockSpec((tm, Din), lambda i: (i, 0)),           # x rows: pipelined
            pl.BlockSpec((n, Din, Dout), lambda i: (0, 0, 0)),   # weights: resident
            pl.BlockSpec((n, 1, Dout), lambda i: (0, 0, 0)),     # biases: resident
        ],
        out_specs=tuple(pl.BlockSpec((tm, Dout), lambda i: (i, 0)) for _ in range(n)),
        compiler_params=pltpu.CompilerParams(
            dimension_semantics=("parallel",),
            vmem_limit_bytes=_VMEM_LIMIT,
        ),
    )(x2d, w_t_stacked, b_stacked)


# ----------------------------------------------------------------------------
# Kernel 2: tiled sigmoid attention (all heads of one batch element per step)
#   scores = (q / sqrt(hd)) @ k^T; probs = sigmoid(scores); ctx = probs @ v
#   The Sk axis is a reduction axis with a VMEM accumulator (exact: no softmax).
# ----------------------------------------------------------------------------
def _attn_kernel_single(q_ref, k_ref, v_ref, ctx_ref, probs_ref, *, inv_scale):
    # Whole Sk extent in one tile: no accumulator / phases needed.
    q = q_ref[0] * inv_scale        # scale q (nh*tsq*hd) instead of scores (nh*tsq*Sk)
    k = k_ref[0]
    v = v_ref[0]
    scores = jnp.einsum("hqd,hkd->hqk", q, k, preferred_element_type=jnp.float32)
    # Reference clamp(+-1e10) before sigmoid is a no-op (sigmoid saturates) -> dropped.
    probs = jax.nn.sigmoid(scores)
    probs_ref[0] = probs.astype(probs_ref.dtype)
    ctx_ref[0] = jnp.einsum("hqk,hkd->hqd", probs, v,
                            preferred_element_type=jnp.float32).astype(ctx_ref.dtype)


def _attn_kernel_multi(q_ref, k_ref, v_ref, ctx_ref, probs_ref, acc_ref, *, inv_scale):
    ki = pl.program_id(2)

    @pl.when(ki == 0)
    def _init():
        acc_ref[...] = jnp.zeros_like(acc_ref)

    q = q_ref[0] * inv_scale        # (nh, tsq, hd)
    k = k_ref[0]                    # (nh, tsk, hd)
    v = v_ref[0]                    # (nh, tsk, hd)

    # Contract on stored K layout (no k.T); f32 accumulation on the MXU.
    scores = jnp.einsum("hqd,hkd->hqk", q, k, preferred_element_type=jnp.float32)
    probs = jax.nn.sigmoid(scores)
    probs_ref[0] = probs.astype(probs_ref.dtype)

    # Sigmoid attention has no row normalization, so plain accumulation over
    # Sk tiles is exact (no online-softmax machinery needed).
    acc_ref[...] += jnp.einsum("hqk,hkd->hqd", probs, v,
                               preferred_element_type=jnp.float32)

    @pl.when(ki == pl.num_programs(2) - 1)
    def _finalize():
        ctx_ref[0] = acc_ref[...].astype(ctx_ref.dtype)


def sigmoid_attention(q4, k4, v4, *, head_size):
    """q4: (B, nh, Sq, hd); k4/v4: (B, nh, Sk, hd)
    -> ctx (B, nh, Sq, hd), probs (B, nh, Sq, Sk)."""
    B, nh, Sq, hd = q4.shape
    Sk = k4.shape[2]
    tsq, tsk = _attn_tile_sizes(Sq, Sk, nh, hd)
    nq, nk = Sq // tsq, Sk // tsk
    inv_scale = 1.0 / math.sqrt(float(head_size))

    out_shape = (
        jax.ShapeDtypeStruct((B, nh, Sq, hd), jnp.float32),
        jax.ShapeDtypeStruct((B, nh, Sq, Sk), jnp.float32),
    )

    if nk == 1:
        # Single-pass variant: no scratch accumulator, no init/finalize phases.
        ctx, probs = pl.pallas_call(
            partial(_attn_kernel_single, inv_scale=inv_scale),
            out_shape=out_shape,
            grid=(B, nq),
            in_specs=[
                pl.BlockSpec((1, nh, tsq, hd), lambda b, qi: (b, 0, qi, 0)),
                pl.BlockSpec((1, nh, Sk, hd), lambda b, qi: (b, 0, 0, 0)),
                pl.BlockSpec((1, nh, Sk, hd), lambda b, qi: (b, 0, 0, 0)),
            ],
            out_specs=(
                pl.BlockSpec((1, nh, tsq, hd), lambda b, qi: (b, 0, qi, 0)),
                pl.BlockSpec((1, nh, tsq, Sk), lambda b, qi: (b, 0, qi, 0)),
            ),
            compiler_params=pltpu.CompilerParams(
                dimension_semantics=("parallel", "parallel"),
                vmem_limit_bytes=_VMEM_LIMIT,
            ),
        )(q4, k4, v4)
        return ctx, probs

    ctx, probs = pl.pallas_call(
        partial(_attn_kernel_multi, inv_scale=inv_scale),
        out_shape=out_shape,
        grid=(B, nq, nk),
        in_specs=[
            pl.BlockSpec((1, nh, tsq, hd), lambda b, qi, ki: (b, 0, qi, 0)),
            pl.BlockSpec((1, nh, tsk, hd), lambda b, qi, ki: (b, 0, ki, 0)),
            pl.BlockSpec((1, nh, tsk, hd), lambda b, qi, ki: (b, 0, ki, 0)),
        ],
        out_specs=(
            pl.BlockSpec((1, nh, tsq, hd), lambda b, qi, ki: (b, 0, qi, 0)),
            pl.BlockSpec((1, nh, tsq, tsk), lambda b, qi, ki: (b, 0, qi, ki)),
        ),
        scratch_shapes=[pltpu.VMEM((nh, tsq, hd), jnp.float32)],
        compiler_params=pltpu.CompilerParams(
            dimension_semantics=("parallel", "parallel", "arbitrary"),
            vmem_limit_bytes=_VMEM_LIMIT,
        ),
    )(q4, k4, v4)
    return ctx, probs


# ----------------------------------------------------------------------------
# ManifoldMHA forward (Euclidean / is_flat branch)
# ----------------------------------------------------------------------------
def manifold_mha_forward(params, query, key=None, value=None):
    """query/key/value: (seq, batch, hidden) float32 -> (context, attention_probs)."""
    if key is None:
        key = query
    if value is None:
        value = query

    H = params["hidden_size"]
    nh = params["num_heads"]
    hd = H // nh

    self_attn = (key is query) and (value is query)

    # permute(1, 0, 2): (S, B, H) -> (B, S, H)
    # TODO(synk): this transpose (and the final one) stays as a plain XLA op; folding
    # it into BlockSpec index_maps is blocked by the reference's raw `view` semantics.
    q_bsH = jnp.transpose(query, (1, 0, 2))
    B, Sq, _ = q_bsH.shape

    if self_attn:
        Sk = Sq
        w_qkv_t = params.get("w_qkv_t")
        if w_qkv_t is None:
            w_qkv_t = jnp.stack([params["wq"].T, params["wk"].T, params["wv"].T])
        b_qkv = params.get("b_qkv")
        if b_qkv is None:
            b_qkv = jnp.stack([params["bq"], params["bk"], params["bv"]])[:, None, :]
        mixed_q, mixed_k, mixed_v = multi_projection(
            q_bsH.reshape(B * Sq, H), w_qkv_t, b_qkv)
    else:
        k_bsH = jnp.transpose(key, (1, 0, 2))
        Sk = k_bsH.shape[1]
        (mixed_q,) = multi_projection(
            q_bsH.reshape(B * Sq, H),
            params["wq"].T[None], params["bq"][None, None, :])
        if key is value:
            # Fuse K/V projections: the shared input is read from HBM once.
            w_kv_t = jnp.stack([params["wk"].T, params["wv"].T])
            b_kv = jnp.stack([params["bk"], params["bv"]])[:, None, :]
            mixed_k, mixed_v = multi_projection(k_bsH.reshape(B * Sk, H), w_kv_t, b_kv)
        else:
            v_bsH = jnp.transpose(value, (1, 0, 2))
            (mixed_k,) = multi_projection(
                k_bsH.reshape(B * Sk, H),
                params["wk"].T[None], params["bk"][None, None, :])
            (mixed_v,) = multi_projection(
                v_bsH.reshape(B * Sk, H),
                params["wv"].T[None], params["bv"][None, None, :])

    # logmap0 / expmap0 are identity on the Euclidean ball.
    # Reproduce the reference `view(-1, num_heads, parts, head_size)` exactly
    # (row-major reshape of the contiguous (B, S, H) tensor, NOT a head transpose).
    q4 = mixed_q.reshape(B, nh, Sq, hd)
    k4 = mixed_k.reshape(B, nh, Sk, hd)
    v4 = mixed_v.reshape(B, nh, Sk, hd)

    ctx, attention_probs = sigmoid_attention(q4, k4, v4, head_size=hd)

    # permute(0, 2, 1, 3) -> (B, Sq, nh, hd); view -> (B, Sq, H); permute(1, 0, 2)
    context_layer = jnp.transpose(ctx, (0, 2, 1, 3)).reshape(B, Sq, H)
    context_layer = jnp.transpose(context_layer, (1, 0, 2))
    return context_layer, attention_probs


# ----------------------------------------------------------------------------
# Deterministic parameter init (matches shapes of Manifold_Linear(H, H))
# ----------------------------------------------------------------------------
def init_params(rng, hidden_size, num_heads):
    keys = jax.random.split(rng, 6)
    bound_w = math.sqrt(6.0 / ((1.0 + 0.01 ** 2) * hidden_size))   # kaiming_uniform(a=0.01)
    bound_b = 1.0 / math.sqrt(hidden_size)

    def w(k):
        return jax.random.uniform(k, (hidden_size, hidden_size), jnp.float32,
                                  minval=-bound_w, maxval=bound_w)

    def b(k):
        return jax.random.uniform(k, (hidden_size,), jnp.float32,
                                  minval=-bound_b, maxval=bound_b)

    p = {
        "hidden_size": hidden_size,
        "num_heads": num_heads,
        "wq": w(keys[0]), "bq": b(keys[1]),
        "wk": w(keys[2]), "bk": b(keys[3]),
        "wv": w(keys[4]), "bv": b(keys[5]),
    }
    # Pre-stacked / pre-transposed weights for the fused QKV kernel (done once,
    # so the forward pass never materializes weight.T).
    p["w_qkv_t"] = jnp.stack([p["wq"].T, p["wk"].T, p["wv"].T])        # (3, H, H)
    p["b_qkv"] = jnp.stack([p["bq"], p["bk"], p["bv"]])[:, None, :]    # (3, 1, H)
    return p


# ----------------------------------------------------------------------------
# Pure-JAX reference (Euclidean branch of the PyTorch module) for verification
# ----------------------------------------------------------------------------
def _reference_forward(params, query):
    H = params["hidden_size"]
    nh = params["num_heads"]
    hd = H // nh
    hp = jax.lax.Precision.HIGHEST
    x = jnp.transpose(query, (1, 0, 2))                     # (B, S, H)
    B, S, _ = x.shape

    def lin(x, w, b):
        return jnp.einsum("bsh,oh->bso", x, w, precision=hp) + b

    q = lin(x, params["wq"], params["bq"]).reshape(B, nh, S, hd)
    k = lin(x, params["wk"], params["bk"]).reshape(B, nh, S, hd)
    v = lin(x, params["wv"], params["bv"]).reshape(B, nh, S, hd)
    scores = jnp.einsum("bnqd,bnkd->bnqk", q, k, precision=hp) / math.sqrt(hd)
    probs = jax.nn.sigmoid(jnp.clip(scores, -1.0e10, 1.0e10))
    ctx = jnp.einsum("bnqk,bnkd->bnqd", probs, v, precision=hp)
    ctx = jnp.transpose(ctx, (0, 2, 1, 3)).reshape(B, S, H)
    return jnp.transpose(ctx, (1, 0, 2)), probs


if __name__ == "__main__":
    seq, batch, hidden, num_heads = 8, 2, 32, 4
    rng = jax.random.PRNGKey(0)
    k_param, k_x = jax.random.split(rng)
    params = init_params(k_param, hidden, num_heads)

    # self-attention: key = value = query
    x = jax.random.normal(k_x, (seq, batch, hidden), jnp.float32)

    context, probs = manifold_mha_forward(params, x)
    context = jax.block_until_ready(context)
    probs = jax.block_until_ready(probs)

    assert context.shape == (seq, batch, hidden)
    assert probs.shape == (batch, num_heads, seq, seq)
    assert bool(jnp.all(jnp.isfinite(context)))

    ctx_ref, probs_ref = _reference_forward(params, x)
    assert bool(jnp.allclose(context, ctx_ref, atol=2e-3, rtol=2e-3))
    assert bool(jnp.allclose(probs, probs_ref, atol=2e-3, rtol=2e-3))

    print("KERNEL_OK")
</pallas_src>

<mosaic_0001>
module attributes {stable_mosaic.version = 11 : i64} {
  func.func @kernel(%arg0: i32, %arg1: memref<16x32xf32, #tpu.memory_space<vmem>>, %arg2: memref<3x32x32xf32, #tpu.memory_space<vmem>>, %arg3: memref<3x1x32xf32, #tpu.memory_space<vmem>>, %arg4: memref<16x32xf32, #tpu.memory_space<vmem>>, %arg5: memref<16x32xf32, #tpu.memory_space<vmem>>, %arg6: memref<16x32xf32, #tpu.memory_space<vmem>>) attributes {dimension_semantics = [#tpu.dimension_semantics<parallel>], iteration_bounds = array<i64: 1>, scalar_prefetch = 0 : i64, scratch_operands = 0 : i64, tpu.core_type = #tpu.core_type<tc>, window_params = [{transform_indices = @transform_0, window_bounds = array<i64: 16, 32>}, {pipeline_mode = #tpu.pipeline_mode<synchronous>, transform_indices = @transform_1, window_bounds = array<i64: 3, 32, 32>}, {pipeline_mode = #tpu.pipeline_mode<synchronous>, transform_indices = @transform_2, window_bounds = array<i64: 3, 1, 32>}, {transform_indices = @transform_3, window_bounds = array<i64: 16, 32>}, {transform_indices = @transform_4, window_bounds = array<i64: 16, 32>}, {transform_indices = @transform_5, window_bounds = array<i64: 16, 32>}]} {
    %c0 = arith.constant 0 : index
    %c0_0 = arith.constant 0 : index
    %0 = vector.load %arg1[%c0, %c0_0] : memref<16x32xf32, #tpu.memory_space<vmem>>, vector<16x32xf32>
    %c0_1 = arith.constant 0 : index
    %c0_2 = arith.constant 0 : index
    %c0_3 = arith.constant 0 : index
    %1 = vector.load %arg2[%c0_1, %c0_2, %c0_3] : memref<3x32x32xf32, #tpu.memory_space<vmem>>, vector<1x32x32xf32>
    %2 = vector.shape_cast %1 : vector<1x32x32xf32> to vector<32x32xf32>
    %cst = arith.constant dense<0.000000e+00> : vector<16x32xf32>
    %3 = tpu.matmul %0, %2, %cst {dimension_numbers = #tpu.dot_dimension_numbers<[1], [0], [0], [1], [0, 0, 1, 1], [], []>} : vector<16x32xf32>, vector<32x32xf32>, vector<16x32xf32> -> vector<16x32xf32>
    %c0_4 = arith.constant 0 : index
    %c0_5 = arith.constant 0 : index
    %c0_6 = arith.constant 0 : index
    %4 = vector.load %arg3[%c0_4, %c0_5, %c0_6] : memref<3x1x32xf32, #tpu.memory_space<vmem>>, vector<1x1x32xf32>
    %5 = vector.shape_cast %4 : vector<1x1x32xf32> to vector<1x32xf32>
    %6 = vector.broadcast %5 : vector<1x32xf32> to vector<16x32xf32>
    %7 = arith.addf %3, %6 : vector<16x32xf32>
    %c0_7 = arith.constant 0 : index
    %c0_8 = arith.constant 0 : index
    %8 = vector.load %arg4[%c0_7, %c0_8] : memref<16x32xf32, #tpu.memory_space<vmem>>, vector<16x32xf32>
    tpu.vector_store %arg4[%c0_7, %c0_8], %7 {strides = array<i32>} : memref<16x32xf32, #tpu.memory_space<vmem>>, vector<16x32xf32>,
    %c1 = arith.constant 1 : index
    %c0_9 = arith.constant 0 : index
    %c0_10 = arith.constant 0 : index
    %9 = vector.load %arg2[%c1, %c0_9, %c0_10] : memref<3x32x32xf32, #tpu.memory_space<vmem>>, vector<1x32x32xf32>
    %10 = vector.shape_cast %9 : vector<1x32x32xf32> to vector<32x32xf32>
    %cst_11 = arith.constant dense<0.000000e+00> : vector<16x32xf32>
    %11 = tpu.matmul %0, %10, %cst_11 {dimension_numbers = #tpu.dot_dimension_numbers<[1], [0], [0], [1], [0, 0, 1, 1], [], []>} : vector<16x32xf32>, vector<32x32xf32>, vector<16x32xf32> -> vector<16x32xf32>
    %c1_12 = arith.constant 1 : index
    %c0_13 = arith.constant 0 : index
    %c0_14 = arith.constant 0 : index
    %12 = vector.load %arg3[%c1_12, %c0_13, %c0_14] : memref<3x1x32xf32, #tpu.memory_space<vmem>>, vector<1x1x32xf32>
    %13 = vector.shape_cast %12 : vector<1x1x32xf32> to vector<1x32xf32>
    %14 = vector.broadcast %13 : vector<1x32xf32> to vector<16x32xf32>
    %15 = arith.addf %11, %14 : vector<16x32xf32>
    %c0_15 = arith.constant 0 : index
    %c0_16 = arith.constant 0 : index
    %16 = vector.load %arg5[%c0_15, %c0_16] : memref<16x32xf32, #tpu.memory_space<vmem>>, vector<16x32xf32>
    tpu.vector_store %arg5[%c0_15, %c0_16], %15 {strides = array<i32>} : memref<16x32xf32, #tpu.memory_space<vmem>>, vector<16x32xf32>,
    %c2 = arith.constant 2 : index
    %c0_17 = arith.constant 0 : index
    %c0_18 = arith.constant 0 : index
    %17 = vector.load %arg2[%c2, %c0_17, %c0_18] : memref<3x32x32xf32, #tpu.memory_space<vmem>>, vector<1x32x32xf32>
    %18 = vector.shape_cast %17 : vector<1x32x32xf32> to vector<32x32xf32>
    %cst_19 = arith.constant dense<0.000000e+00> : vector<16x32xf32>
    %19 = tpu.matmul %0, %18, %cst_19 {dimension_numbers = #tpu.dot_dimension_numbers<[1], [0], [0], [1], [0, 0, 1, 1], [], []>} : vector<16x32xf32>, vector<32x32xf32>, vector<16x32xf32> -> vector<16x32xf32>
    %c2_20 = arith.constant 2 : index
    %c0_21 = arith.constant 0 : index
    %c0_22 = arith.constant 0 : index
    %20 = vector.load %arg3[%c2_20, %c0_21, %c0_22] : memref<3x1x32xf32, #tpu.memory_space<vmem>>, vector<1x1x32xf32>
    %21 = vector.shape_cast %20 : vector<1x1x32xf32> to vector<1x32xf32>
    %22 = vector.broadcast %21 : vector<1x32xf32> to vector<16x32xf32>
    %23 = arith.addf %19, %22 : vector<16x32xf32>
    %c0_23 = arith.constant 0 : index
    %c0_24 = arith.constant 0 : index
    %24 = vector.load %arg6[%c0_23, %c0_24] : memref<16x32xf32, #tpu.memory_space<vmem>>, vector<16x32xf32>
    tpu.vector_store %arg6[%c0_23, %c0_24], %23 {strides = array<i32>} : memref<16x32xf32, #tpu.memory_space<vmem>>, vector<16x32xf32>,
    return
  }
  func.func @transform_0(%arg0: i32) -> (i32, i32) {
    %c0_i32 = arith.constant 0 : i32
    %c0_i32_0 = arith.constant 0 : i32
    return %arg0, %c0_i32 : i32, i32
  }
  func.func @transform_1(%arg0: i32) -> (i32, i32, i32) {
    %c0_i32 = arith.constant 0 : i32
    %c0_i32_0 = arith.constant 0 : i32
    %c0_i32_1 = arith.constant 0 : i32
    %c0_i32_2 = arith.constant 0 : i32
    return %c0_i32, %c0_i32_0, %c0_i32_1 : i32, i32, i32
  }
  func.func @transform_2(%arg0: i32) -> (i32, i32, i32) {
    %c0_i32 = arith.constant 0 : i32
    %c0_i32_0 = arith.constant 0 : i32
    %c0_i32_1 = arith.constant 0 : i32
    %c0_i32_2 = arith.constant 0 : i32
    return %c0_i32, %c0_i32_0, %c0_i32_1 : i32, i32, i32
  }
  func.func @transform_3(%arg0: i32) -> (i32, i32) {
    %c0_i32 = arith.constant 0 : i32
    %c0_i32_0 = arith.constant 0 : i32
    return %arg0, %c0_i32 : i32, i32
  }
  func.func @transform_4(%arg0: i32) -> (i32, i32) {
    %c0_i32 = arith.constant 0 : i32
    %c0_i32_0 = arith.constant 0 : i32
    return %arg0, %c0_i32 : i32, i32
  }
  func.func @transform_5(%arg0: i32) -> (i32, i32) {
    %c0_i32 = arith.constant 0 : i32
    %c0_i32_0 = arith.constant 0 : i32
    return %arg0, %c0_i32 : i32, i32
  }
}

</mosaic_0001>

<bundles_post_ra>
// kernel: tpu_custom_call.1
= control target key start
LH: loop header
LB: loop body
LE: loop exit
PB: predicated region body
PF: predicated region fallthrough
CT: control target
= control target key end

     0   :  { %11 = vsyncpa [#allocation3], 0  ;;  %s724_s0 = inlined_call_operand.hbm [shape: f32[16,32], index: 0, kind: input, shape index: {}]   ;;  %s725_s1 = inlined_call_operand.hbm [shape: f32[3,32,32], index: 1, kind: input, shape index: {}]   ;;  %s726_s2 = inlined_call_operand.vmem [shape: f32[3,1,32], index: 2, kind: input, shape index: {}]   ;;  %s727_s3 = inlined_call_operand.hbm [shape: f32[16,32], index: 3, kind: output, shape index: {0}]   ;;  %s728_s4 = inlined_call_operand.hbm [shape: f32[16,32], index: 4, kind: output, shape index: {1}]   ;;  %s729_s5 = inlined_call_operand.hbm [shape: f32[16,32], index: 5, kind: output, shape index: {2}]  }
   0x1   :  { %12 = vsyncpa [#allocation6], 0 }
   0x2   :  { %13 = vsyncpa [#allocation4], 0 }
   0x3   :  { %14 = vsyncpa [#allocation9], 0  ;;  %s584_s18 = smov [#allocation2]   ;;  %s466_s22 = scalar_lea.hbm %s724_s0, 256 }
   0x4   :  { %s20_s19 = sshll.u32 %s584_s18, 4  ;;  %p467_p0 = scmp.ne.s32.totalorder %s724_s0, %s466_s22  ;;  %s21_s19 = int_to_ptr.vmem [resolvable:$true] %s20_s19 }
   0x5   :  { %p470_p1 = scmp.lt.u32.totalorder %s466_s22, %s724_s0 }
   0x7   :  { %p472_p2 = pnand %p470_p1, %p467_p0 }
   0x9   :  { %475 = shalt.err (!%p472_p2)
}
   0xa   :  { %s476_s27 = scalar_lea.vmem %s21_s19, 256  ;;  %p481_p4 = scmp.lt.s32.totalorder %s21_s19, %s21_s19 }
   0xb   :  { %p477_p3 = scmp.ne.s32.totalorder %s21_s19, %s476_s27  ;;  %p482_p5 = scmp.lt.s32.totalorder %s476_s27, %s476_s27 }
   0xd   :  { %p483_p6 = por %p482_p5, %p481_p4 }
   0xf   :  { %p484_p7 = pnand %p483_p6, %p477_p3 }
  0x11   :  { %487 = shalt.err (!%p484_p7)
}
  0x12   :  { %s585_s28 = smov 128   ;;  %s586_s29 = smov 8  }
  0x13   :  { %26 = dma.hbm_to_vmem [thread:$0]  %s724_s0, 256, %s21_s19, [#allocation3], %s585_s28, %s585_s28, %s586_s29  }
  0x14   :  { %s587_s7 = smov [#allocation5]   ;;  %s488_s11 = scalar_lea.hbm %s725_s1, 1536 }
  0x15   :  { %s32_s8 = sshll.u32 %s587_s7, 4  ;;  %p489_p8 = scmp.ne.s32.totalorder %s725_s1, %s488_s11  ;;  %s33_s8 = int_to_ptr.vmem [resolvable:$true] %s32_s8 }
  0x16   :  { %p492_p9 = scmp.lt.u32.totalorder %s488_s11, %s725_s1 }
  0x18   :  { %p494_p10 = pnand %p492_p9, %p489_p8 }
  0x1a   :  { %497 = shalt.err (!%p494_p10)
}
  0x1b   :  { %s498_s16 = scalar_lea.vmem %s33_s8, 1536  ;;  %p503_p12 = scmp.lt.s32.totalorder %s33_s8, %s33_s8 }
  0x1c   :  { %p499_p11 = scmp.ne.s32.totalorder %s33_s8, %s498_s16  ;;  %p504_p13 = scmp.lt.s32.totalorder %s498_s16, %s498_s16 }
  0x1e   :  { %p505_p0 = por %p504_p13, %p503_p12 }
  0x20   :  { %p506_p1 = pnand %p505_p0, %p499_p11 }
  0x22   :  { %509 = shalt.err (!%p506_p1)
}
  0x23   :  { %38 = dma.hbm_to_vmem [thread:$0]  %s725_s1, 1536, %s33_s8, [#allocation6], %s585_s28, %s585_s28, %s586_s29  }
  0x24   :  { %576 = dma.done.wait [#allocation3], 256  }
  0x25   :  { %577 = vsyncadd [#allocation3], 4294967040 }
  0x26   :  { %578 = dma.done.wait [#allocation6], 1536  }
  0x27   :  { %579 = vsyncadd [#allocation6], 4294965760  ;;  %v49_v0 = vld [vmem:[#allocation5] sm:$0xff]  ;;  %v50_v1 = vld [vmem:[#allocation5 + $0x8] sm:$0xff]  ;;  %vm60_vm0 = vcmask 261120   ;;  %s588_s21 = smov [#allocation7]  }
  0x28   :  { %v51_v2 = vld [vmem:[#allocation5 + $0x10] sm:$0xff]  ;;  %v435_v3 = vpack.c.bf16 %v50_v1, %v49_v0  ;;  %v52_v4 = vld [vmem:[#allocation5 + $0x18] sm:$0xff]  ;;  %v145_v5 = vld [vmem:[#allocation5 + $0x20] sm:$0xff]  ;;  %s329_s22 = sshll.u32 %s588_s21, 4  ;;  %s589_s23 = smov [#allocation8]   ;;  %s330_s22 = int_to_ptr.vmem [resolvable:$true] %s329_s22 }
  0x29   :  { %v146_v6 = vld [vmem:[#allocation5 + $0x28] sm:$0xff]  ;;  %v439_v7 = vpack.c.bf16 %v52_v4, %v51_v2  ;;  %v47_v9 = vld [vmem:[#allocation2] sm:$0xff]  ;;  %v235_v10 = vld [vmem:[#allocation5 + $0x40] sm:$0xff]  ;;  %s341_s24 = sshll.u32 %s589_s23, 4  ;;  %s510_s27 = scalar_lea.vmem %s330_s22, 256  ;;  %s664_s24 = int_to_ptr.vmem [resolvable:$true] %s341_s24 }
  0x2a   :  { %v443_v8 = vpack.c.bf16 %v146_v6, %v145_v5  ;;  %436 = vmatprep.subr.bf16.mxu0 %v435_v3  ;;  %410 = vmatprep.mubr.msk.f32.mxu0 %vm60_vm0, %v47_v9  ;;  %v236_v11 = vld [vmem:[#allocation5 + $0x48] sm:$0xff]  ;;  %v147_v12 = vld [vmem:[#allocation5 + $0x30] sm:$0xff]  ;;  %v148_v13 = vld [vmem:[#allocation5 + $0x38] sm:$0xff]  ;;  %p511_p2 = scmp.ne.s32.totalorder %s330_s22, %s510_s27  ;;  %p515_p3 = scmp.lt.s32.totalorder %s330_s22, %s330_s22 }
  0x2b   :  { %438 = vmatpush3.bf16.msra.mxu0 %v435_v3  ;;  %v447_v14 = vpack.c.bf16 %v148_v13, %v147_v12  ;;  %v451_v15 = vpack.c.bf16 %v236_v11, %v235_v10  ;;  %v237_v16 = vld [vmem:[#allocation5 + $0x50] sm:$0xff]  ;;  %v238_v17 = vld [vmem:[#allocation5 + $0x58] sm:$0xff]  ;;  %421 = vmatprep.mubr.msk.f32.mxu1 %vm60_vm0, %v47_v9  ;;  %p516_p4 = scmp.lt.s32.totalorder %s510_s27, %s510_s27 }
  0x2c   :  { %444 = vmatprep.subr.bf16.mxu1 %v443_v8  ;;  %440 = vmatprep.subr.bf16.mxu0 %v439_v7  ;;  %v48_v18 = vld [vmem:[#allocation2 + $0x8] sm:$0xff]  ;;  %v455_v19 = vpack.c.bf16 %v238_v17, %v237_v16  ;;  %v373_v20 = vld [vmem:[%s726_s2] ss:$0 sm:$0xff]  ;;  %v377_v21 = vld [vmem:[%s726_s2 + $0x1] ss:$0 sm:$0xff] }
  0x2d   :  { %446 = vmatpush3.bf16.msra.mxu1 %v443_v8  ;;  %v381_v30 = vld [vmem:[%s726_s2 + $0x2] ss:$0 sm:$0xff]  ;;  %p517_p5 = por %p516_p4, %p515_p3 }
  0x2e   :  { %448 = vmatprep.subr.bf16.mxu1 %v447_v14 }
  0x2f   :  { %442 = vmatpush3.bf16.msra.mxu0 %v439_v7  ;;  %p518_p6 = pnand %p517_p5, %p511_p2 }
  0x30   :  { %452 = vmatprep.subr.bf16.mxu0 %v451_v15 }
  0x31   :  { %450 = vmatpush3.bf16.msra.mxu1 %v447_v14 }
  0x32   :  { %411 = vmatmul.mubr.msk.f32.vlgmr.msra.gmra.mrb[0].mxu0 %vm60_vm0, %v48_v18 }
  0x33   :  { %454 = vmatpush3.bf16.msra.mxu0 %v451_v15  ;;  %432 = vmatprep.mubr.msk.f32.mxu0 %vm60_vm0, %v47_v9 }
  0x34   :  { %422 = vmatmul.mubr.msk.f32.vlgmr.msra.gmra.mrb[0].mxu1 %vm60_vm0, %v48_v18  ;;  %456 = vmatprep.subr.bf16.mxu0 %v455_v19 }
  0x37   :  { %458 = vmatpush3.bf16.msra.mxu0 %v455_v19 }
  0x3a   :  { %433 = vmatmul.mubr.msk.f32.vlgmr.msra.gmra.mrb[2].mxu0 %vm60_vm0, %v48_v18 }
 0x105   :  { %v412_v22 = vpop.f32.mrb[0].mxu0 }
 0x106   :  { %v139_v23 = vadd.f32 %v412_v22, %v373_v20  ;;  %v133_v24 = vpop.f32.mrb[1].mxu0 }
 0x107   :  { %v423_v25 = vpop.f32.mrb[0].mxu1  ;;  %v134_v26 = vadd.f32 %v373_v20, %v133_v24 }
 0x108   :  { %v229_v27 = vadd.f32 %v423_v25, %v377_v21  ;;  %v223_v28 = vpop.f32.mrb[1].mxu1  ;;  %143 = vst.msk [vmem:[#allocation7 + $0x8] sm:$0xff] %vm60_vm0, %v139_v23 }
 0x109   :  { %v224_v29 = vadd.f32 %v377_v21, %v223_v28  ;;  %142 = vst.msk [vmem:[#allocation7] sm:$0xff] %vm60_vm0, %v134_v26 }
 0x10a   :  { %233 = vst.msk [vmem:[#allocation8 + $0x8] sm:$0xff] %vm60_vm0, %v229_v27 }
 0x10b   :  { %232 = vst.msk [vmem:[#allocation8] sm:$0xff] %vm60_vm0, %v224_v29 }
 0x10c   :  { %521 = shalt.err (!%p518_p6)
}
 0x10d   :  { %s522_s7 = scalar_lea.hbm %s727_s3, 256 }
 0x10e   :  { %p523_p7 = scmp.ne.s32.totalorder %s727_s3, %s522_s7  ;;  %p526_p8 = scmp.lt.u32.totalorder %s522_s7, %s727_s3 }
 0x110   :  { %p528_p9 = pnand %p526_p8, %p523_p7 }
 0x112   :  { %531 = shalt.err (!%p528_p9)
}
 0x113   :  { %335 = dma.vmem_to_hbm [thread:$0]  %s330_s22, 256, %s727_s3, [#allocation4], %s585_s28, %s585_s28, %s586_s29  }
 0x114   :  { %s532_s13 = scalar_lea.vmem %s664_s24, 256  ;;  %p537_p11 = scmp.lt.s32.totalorder %s664_s24, %s664_s24 }
 0x115   :  { %p533_p10 = scmp.ne.s32.totalorder %s664_s24, %s532_s13  ;;  %p538_p12 = scmp.lt.s32.totalorder %s532_s13, %s532_s13 }
 0x117   :  { %p539_p13 = por %p538_p12, %p537_p11 }
 0x119   :  { %p540_p0 = pnand %p539_p13, %p533_p10 }
 0x11b   :  { %543 = shalt.err (!%p540_p0)
}
 0x11c   :  { %s544_s16 = scalar_lea.hbm %s728_s4, 256 }
 0x11d   :  { %p545_p1 = scmp.ne.s32.totalorder %s728_s4, %s544_s16  ;;  %p548_p2 = scmp.lt.u32.totalorder %s544_s16, %s728_s4 }
 0x11f   :  { %p550_p3 = pnand %p548_p2, %p545_p1 }
 0x121   :  { %553 = shalt.err (!%p550_p3)
}
 0x122   :  { %347 = dma.vmem_to_hbm [thread:$0]  %s664_s24, 256, %s728_s4, [#allocation9], %s585_s28, %s585_s28, %s586_s29   ;;  %v434_v31 = vpop.f32.mrb[2].mxu0 }
 0x123   :  { %s590_s20 = smov [#allocation10]   ;;  %v319_v32 = vadd.f32 %v434_v31, %v381_v30  ;;  %v313_v33 = vpop.f32.mrb[3].mxu0 }
 0x124   :  { %s353_s21 = sshll.u32 %s590_s20, 4  ;;  %v314_v34 = vadd.f32 %v381_v30, %v313_v33  ;;  %s354_s21 = int_to_ptr.vmem [resolvable:$true] %s353_s21 }
 0x125   :  { %323 = vst.msk [vmem:[#allocation10 + $0x8] sm:$0xff] %vm60_vm0, %v319_v32  ;;  %s554_s22 = scalar_lea.vmem %s354_s21, 256  ;;  %p559_p5 = scmp.lt.s32.totalorder %s354_s21, %s354_s21 }
 0x126   :  { %322 = vst.msk [vmem:[#allocation10] sm:$0xff] %vm60_vm0, %v314_v34  ;;  %p555_p4 = scmp.ne.s32.totalorder %s354_s21, %s554_s22  ;;  %p560_p6 = scmp.lt.s32.totalorder %s554_s22, %s554_s22 }
 0x128   :  { %p561_p7 = por %p560_p6, %p559_p5 }
 0x12a   :  { %p562_p8 = pnand %p561_p7, %p555_p4 }
 0x12c   :  { %565 = shalt.err (!%p562_p8)
}
 0x12d   :  { %s566_s24 = scalar_lea.hbm %s729_s5, 256 }
 0x12e   :  { %p567_p9 = scmp.ne.s32.totalorder %s729_s5, %s566_s24  ;;  %p570_p10 = scmp.lt.u32.totalorder %s566_s24, %s729_s5 }
 0x130   :  { %p572_p11 = pnand %p570_p10, %p567_p9 }
 0x132   :  { %575 = shalt.err (!%p572_p11)
}
 0x133   :  { %359 = dma.vmem_to_hbm [thread:$0]  %s354_s21, 256, %s729_s5, [#allocation9], %s585_s28, %s585_s28, %s586_s29  }
 0x134   :  { %580 = dma.done.wait [#allocation4], 256  }
 0x135   :  { %581 = vsyncadd [#allocation4], 4294967040 }
 0x136   :  { %582 = dma.done.wait [#allocation9], 512  }
 0x137   :  { %583 = vsyncadd [#allocation9], 4294966784 }
 0x138   :  { %369 = vsyncpa [#allocation3], 1 }
 0x139   :  { %370 = vsyncpa [#allocation6], 1 }
 0x13a   :  { %371 = vsyncpa [#allocation4], 1 }
 0x13b   :  { %372 = vsyncpa [#allocation9], 1 }

</bundles_post_ra>
